<compile_context>
chip_gen: v5e
topology: v5e:2x2
jax: 0.10.0
libtpu: 0.0.40
codegen_flags: <defaults>
</compile_context>

<pallas_src>
import math

import jax
import jax.numpy as jnp
from jax.experimental import pallas as pl
from jax.experimental.pallas import tpu as pltpu

_LN_EPS = 1e-5
_OUT_DIM = 5    # 4 quality aspects + overall MOS
_OUT_PAD = 8    # small zero-padded head width (32 B/row f32 writeback)


def _gelu_exact(x):
    # PyTorch nn.GELU() default: exact erf formulation (kept for parity).
    return 0.5 * x * (1.0 + jax.lax.erf(x * (1.0 / math.sqrt(2.0))))


def mos_predictor_kernel(
    x_ref,        # (TILE_B, D)        f32 or bf16 feature tile
    w1_ref,       # (D, H)             bf16 (LayerNorm affine folded in)
    b1_ref,       # (1, H)             f32
    w2_ref,       # (H, H2)            bf16
    b2_ref,       # (1, H2)            f32
    w3_ref,       # (H2, _OUT_PAD)     bf16 (zero-padded head)
    b3_ref,       # (1, _OUT_PAD)      f32 (zero-padded head)
    o_ref,        # (TILE_B, _OUT_PAD) f32 output tile (real scores in 0..4)
):
    # Upcast inside the kernel (input may be DMA'd as bf16 for the byte diet).
    x = x_ref[...].astype(jnp.float32)

    # --- LayerNorm statistics in f32 (affine folded into w1/b1 at prep) ---
    mu = jnp.mean(x, axis=-1, keepdims=True)
    xc = x - mu
    var = jnp.mean(xc * xc, axis=-1, keepdims=True)
    xn = (xc * jax.lax.rsqrt(var + _LN_EPS)).astype(w1_ref.dtype)  # fused cast

    # --- Linear(D -> H) + GELU  (bf16 MXU operands, f32 accumulation) ---
    h1 = jnp.dot(xn, w1_ref[...], preferred_element_type=jnp.float32) + b1_ref[...]
    h1 = _gelu_exact(h1).astype(w2_ref.dtype)
    # Dropout(0.15): identity in eval mode.
    # TODO(synk): training-mode dropout (PRNG masking) not implemented.

    # --- Linear(H -> H/2) + GELU ---
    h2 = jnp.dot(h1, w2_ref[...], preferred_element_type=jnp.float32) + b2_ref[...]
    h2 = _gelu_exact(h2).astype(w3_ref.dtype)

    # --- Linear(H/2 -> padded head) ---
    out = jnp.dot(h2, w3_ref[...], preferred_element_type=jnp.float32) + b3_ref[...]
    o_ref[...] = out.astype(o_ref.dtype)


def _round_up(x, m):
    return (x + m - 1) // m * m


def prepare_params(params, matmul_dtype=jnp.bfloat16):
    """One-time prep: fold LN affine into W1, pad the 5-wide head to 8 lanes,
    cast matmul weights to bf16 (biases stay f32)."""
    gamma = params["ln_gamma"].astype(jnp.float32)   # (1, D)
    beta = params["ln_beta"].astype(jnp.float32)     # (1, D)
    w1 = params["w1"].astype(jnp.float32)            # (D, H)
    b1 = params["b1"].astype(jnp.float32)            # (1, H)
    w2 = params["w2"].astype(jnp.float32)            # (H, H2)
    b2 = params["b2"].astype(jnp.float32)            # (1, H2)
    w3 = params["w3"].astype(jnp.float32)            # (H2, 5)
    b3 = params["b3"].astype(jnp.float32)            # (1, 5)

    # Fold LayerNorm affine: (xn*gamma + beta) @ w1 + b1 == xn @ w1' + b1'.
    w1f = gamma.reshape(-1, 1) * w1
    b1f = beta @ w1 + b1

    # Pad head to a small fixed width (wrapper slices back to 5).
    h2_dim = w3.shape[0]
    w3p = jnp.zeros((h2_dim, _OUT_PAD), jnp.float32).at[:, :_OUT_DIM].set(w3)
    b3p = jnp.zeros((1, _OUT_PAD), jnp.float32).at[:, :_OUT_DIM].set(b3)

    return {
        "w1": w1f.astype(matmul_dtype), "b1": b1f,
        "w2": w2.astype(matmul_dtype), "b2": b2,
        "w3": w3p.astype(matmul_dtype), "b3": b3p,
    }


def mos_predictor(features, prepped, *, tile_b=None):
    """features: (B, input_dim), f32 or bf16. prepped: prepare_params() output."""
    B, D = features.shape
    H = prepped["w1"].shape[1]
    H2 = prepped["w2"].shape[1]

    # Accept f32 or bf16 directly (bf16 halves the input HBM read; the kernel
    # upcasts for the LN statistics). Other dtypes fall back to f32.
    if features.dtype != jnp.float32 and features.dtype != jnp.bfloat16:
        features = features.astype(jnp.float32)
    in_bytes = features.dtype.itemsize

    # Per-row VMEM bytes: double-buffered I/O tiles + f32 activations + the
    # bf16 matmul-operand copies; 1.5x headroom for GELU temps / regalloc.
    per_row = (2 * in_bytes * D                       # input tile (x2 buffers)
               + 2 * 4 * _OUT_PAD                     # output tile (x2 buffers)
               + 4 * (D + H + H2 + _OUT_PAD)          # f32 activations
               + 2 * (D + H + H2))                    # bf16 operand copies
    per_row = int(per_row * 1.5)

    b_ceil = _round_up(max(B, 1), 8)
    if tile_b is None:
        budget = 16 * 1024 * 1024                     # safe on v5e/v6e/v7x
        tile_b = max(8, min(2048, (budget // per_row) // 8 * 8))
        # Keep >= ~8 grid steps for large B: v7x dual-TC sharding + DMA overlap.
        tile_b = min(tile_b, max(512, _round_up(pl.cdiv(B, 8), 8)))
    else:
        tile_b = max(8, _round_up(int(tile_b), 8))
    tile_b = min(tile_b, b_ceil)

    grid_b = pl.cdiv(B, tile_b)   # ragged final block handled by Pallas

    w1, b1 = prepped["w1"], prepped["b1"]
    w2, b2 = prepped["w2"], prepped["b2"]
    w3, b3 = prepped["w3"], prepped["b3"]

    # Explicit VMEM limit from the estimate (conservatively assume the
    # weights are double-buffered), well under v7x's 64 MiB physical VMEM.
    weight_bytes = 2 * (w1.size * w1.dtype.itemsize
                        + w2.size * w2.dtype.itemsize
                        + w3.size * w3.dtype.itemsize
                        + 4 * (b1.size + b2.size + b3.size))
    vmem_limit = int(weight_bytes + per_row * tile_b) + (2 << 20)
    vmem_limit = min(max(vmem_limit, 8 << 20), 48 << 20)

    rows = grid_b * tile_b
    cost = pl.CostEstimate(
        flops=int(2 * rows * (D * H + H * H2 + H2 * _OUT_PAD)),
        transcendentals=int(rows * (H + H2)),
        bytes_accessed=int(in_bytes * rows * D + 4 * rows * _OUT_PAD
                           + weight_bytes // 2),
    )

    def build(weight_pipeline_mode):
        def wspec(shape):
            if weight_pipeline_mode is None:
                return pl.BlockSpec(shape, lambda i: (0, 0))
            return pl.BlockSpec(shape, lambda i: (0, 0),
                                pipeline_mode=weight_pipeline_mode)

        return pl.pallas_call(
            mos_predictor_kernel,
            out_shape=jax.ShapeDtypeStruct((B, _OUT_PAD), jnp.float32),
            grid=(grid_b,),
            in_specs=[
                pl.BlockSpec((tile_b, D), lambda i: (i, 0)),   # features tile
                wspec(w1.shape), wspec(b1.shape),
                wspec(w2.shape), wspec(b2.shape),
                wspec(w3.shape), wspec(b3.shape),
            ],
            out_specs=pl.BlockSpec((tile_b, _OUT_PAD), lambda i: (i, 0)),
            compiler_params=pltpu.CompilerParams(
                dimension_semantics=("parallel",),
                vmem_limit_bytes=vmem_limit),
            cost_estimate=cost,
        )

    try:
        # Grid-invariant weights: request single buffering to save VMEM.
        out = build(pl.Buffered(1))(features, w1, b1, w2, b2, w3, b3)
    except Exception:
        # Fallback if this jax version rejects single-buffered weight specs;
        # correctness is unchanged (only VMEM footprint differs).
        out = build(None)(features, w1, b1, w2, b2, w3, b3)

    return out[:, :_OUT_DIM]


def init_params(key, input_dim, hidden_dim):
    """Deterministic init mimicking PyTorch defaults (raw, un-prepped)."""
    h2 = hidden_dim // 2
    ks = jax.random.split(key, 6)

    def linear_init(kw, kb, fan_in, fan_out):
        bound = 1.0 / math.sqrt(fan_in)
        w = jax.random.uniform(kw, (fan_in, fan_out), jnp.float32, -bound, bound)
        b = jax.random.uniform(kb, (1, fan_out), jnp.float32, -bound, bound)
        return w, b

    w1, b1 = linear_init(ks[0], ks[1], input_dim, hidden_dim)
    w2, b2 = linear_init(ks[2], ks[3], hidden_dim, h2)
    w3, b3 = linear_init(ks[4], ks[5], h2, 5)
    return {
        "ln_gamma": jnp.ones((1, input_dim), jnp.float32),
        "ln_beta": jnp.zeros((1, input_dim), jnp.float32),
        "w1": w1, "b1": b1,
        "w2": w2, "b2": b2,
        "w3": w3, "b3": b3,
    }


def _reference_exact(features, raw):
    """Pure-JAX f32 replica of the PyTorch forward (eval mode)."""
    x = features.astype(jnp.float32)
    mu = jnp.mean(x, axis=-1, keepdims=True)
    var = jnp.mean((x - mu) ** 2, axis=-1, keepdims=True)
    xn = (x - mu) * jax.lax.rsqrt(var + _LN_EPS) * raw["ln_gamma"] + raw["ln_beta"]
    h1 = _gelu_exact(xn @ raw["w1"] + raw["b1"])
    h2 = _gelu_exact(h1 @ raw["w2"] + raw["b2"])
    return h2 @ raw["w3"] + raw["b3"]


def _reference_prepped(features, prepped):
    """Pure-JAX replica with the SAME numerics as the kernel (folded LN,
    bf16 matmul operands, f32 accumulation)."""
    x = features.astype(jnp.float32)
    mu = jnp.mean(x, axis=-1, keepdims=True)
    var = jnp.mean((x - mu) ** 2, axis=-1, keepdims=True)
    xn = (x - mu) * jax.lax.rsqrt(var + _LN_EPS)
    dt = prepped["w1"].dtype
    h1 = _gelu_exact(jnp.dot(xn.astype(dt), prepped["w1"],
                             preferred_element_type=jnp.float32) + prepped["b1"])
    h2 = _gelu_exact(jnp.dot(h1.astype(dt), prepped["w2"],
                             preferred_element_type=jnp.float32) + prepped["b2"])
    out = jnp.dot(h2.astype(dt), prepped["w3"],
                  preferred_element_type=jnp.float32) + prepped["b3"]
    return out[:, :_OUT_DIM]


if __name__ == "__main__":
    INPUT_DIM = 32
    HIDDEN_DIM = 32   # -> hidden//2 = 16, head = 5 (padded to 8)
    BATCH = 13        # not a multiple of the tile -> exercises the ragged block

    key = jax.random.PRNGKey(0)
    k_feat, k_param = jax.random.split(key)
    features = jax.random.normal(k_feat, (BATCH, INPUT_DIM), jnp.float32)
    raw_params = init_params(k_param, INPUT_DIM, HIDDEN_DIM)
    prepped = prepare_params(raw_params)

    # Small explicit tile -> 2 grid steps + ragged tail (pipelining exercised).
    out = jax.block_until_ready(mos_predictor(features, prepped, tile_b=8))
    assert out.shape == (BATCH, _OUT_DIM), out.shape

    # Tight check vs a pure-JAX replica using identical numerics.
    ref_same = _reference_prepped(features, prepped)
    assert jnp.allclose(out, ref_same, atol=2e-3, rtol=2e-3), (
        f"max abs diff vs matched ref {jnp.max(jnp.abs(out - ref_same))}"
    )

    # Sanity check vs exact-f32 PyTorch semantics (slack for bf16 operands).
    ref_f32 = _reference_exact(features, raw_params)
    assert jnp.allclose(out, ref_f32, atol=3e-2, rtol=3e-2), (
        f"max abs diff vs f32 ref {jnp.max(jnp.abs(out - ref_f32))}"
    )

    # bf16 feature path (halves the input HBM read; kernel upcasts internally).
    feats_bf16 = features.astype(jnp.bfloat16)
    out_bf = jax.block_until_ready(mos_predictor(feats_bf16, prepped))
    ref_bf = _reference_prepped(feats_bf16, prepped)
    assert out_bf.shape == (BATCH, _OUT_DIM)
    assert jnp.allclose(out_bf, ref_bf, atol=2e-3, rtol=2e-3), (
        f"max abs diff (bf16 feats) {jnp.max(jnp.abs(out_bf - ref_bf))}"
    )

    print("KERNEL_OK")
</pallas_src>

<mosaic_0001>
module attributes {stable_mosaic.version = 11 : i64} {
  func.func @mos_predictor_kernel(%arg0: i32, %arg1: memref<8x32xf32, #tpu.memory_space<vmem>>, %arg2: memref<32x32xbf16, #tpu.memory_space<vmem>>, %arg3: memref<1x32xf32, #tpu.memory_space<vmem>>, %arg4: memref<32x16xbf16, #tpu.memory_space<vmem>>, %arg5: memref<1x16xf32, #tpu.memory_space<vmem>>, %arg6: memref<16x8xbf16, #tpu.memory_space<vmem>>, %arg7: memref<1x8xf32, #tpu.memory_space<vmem>>, %arg8: memref<8x8xf32, #tpu.memory_space<vmem>>) attributes {dimension_semantics = [#tpu.dimension_semantics<parallel>], iteration_bounds = array<i64: 2>, scalar_prefetch = 0 : i64, scratch_operands = 0 : i64, tpu.core_type = #tpu.core_type<tc>, window_params = [{transform_indices = @transform_0, window_bounds = array<i64: 8, 32>}, {pipeline_mode = #tpu.pipeline_mode<synchronous>, transform_indices = @transform_1, window_bounds = array<i64: 32, 32>}, {pipeline_mode = #tpu.pipeline_mode<synchronous>, transform_indices = @transform_2, window_bounds = array<i64: 1, 32>}, {pipeline_mode = #tpu.pipeline_mode<synchronous>, transform_indices = @transform_3, window_bounds = array<i64: 32, 16>}, {pipeline_mode = #tpu.pipeline_mode<synchronous>, transform_indices = @transform_4, window_bounds = array<i64: 1, 16>}, {pipeline_mode = #tpu.pipeline_mode<synchronous>, transform_indices = @transform_5, window_bounds = array<i64: 16, 8>}, {pipeline_mode = #tpu.pipeline_mode<synchronous>, transform_indices = @transform_6, window_bounds = array<i64: 1, 8>}, {transform_indices = @transform_7, window_bounds = array<i64: 8, 8>}]} {
    %c0 = arith.constant 0 : index
    %c0_0 = arith.constant 0 : index
    %0 = vector.load %arg1[%c0, %c0_0] : memref<8x32xf32, #tpu.memory_space<vmem>>, vector<8x32xf32>
    %cst = arith.constant dense<0.000000e+00> : vector<8xf32>
    %1 = vector.multi_reduction <add>, %0, %cst [1] : vector<8x32xf32> to vector<8xf32>
    %2 = vector.shape_cast %1 : vector<8xf32> to vector<8x1xf32>
    %cst_1 = arith.constant 3.200000e+01 : f32
    %3 = vector.broadcast %cst_1 : f32 to vector<8x1xf32>
    %4 = arith.divf %2, %3 : vector<8x1xf32>
    %5 = vector.broadcast %4 : vector<8x1xf32> to vector<8x32xf32>
    %6 = arith.subf %0, %5 : vector<8x32xf32>
    %7 = arith.mulf %6, %6 : vector<8x32xf32>
    %cst_2 = arith.constant dense<0.000000e+00> : vector<8xf32>
    %8 = vector.multi_reduction <add>, %7, %cst_2 [1] : vector<8x32xf32> to vector<8xf32>
    %9 = vector.shape_cast %8 : vector<8xf32> to vector<8x1xf32>
    %cst_3 = arith.constant 3.200000e+01 : f32
    %10 = vector.broadcast %cst_3 : f32 to vector<8x1xf32>
    %11 = arith.divf %9, %10 : vector<8x1xf32>
    %cst_4 = arith.constant 9.99999974E-6 : f32
    %12 = vector.broadcast %cst_4 : f32 to vector<8x1xf32>
    %13 = arith.addf %11, %12 : vector<8x1xf32>
    %14 = math.rsqrt %13 : vector<8x1xf32>
    %15 = vector.broadcast %14 : vector<8x1xf32> to vector<8x32xf32>
    %16 = arith.mulf %6, %15 : vector<8x32xf32>
    %17 = arith.truncf %16 : vector<8x32xf32> to vector<8x32xbf16>
    %c0_5 = arith.constant 0 : index
    %c0_6 = arith.constant 0 : index
    %18 = vector.load %arg2[%c0_5, %c0_6] : memref<32x32xbf16, #tpu.memory_space<vmem>>, vector<32x32xbf16>
    %cst_7 = arith.constant dense<0.000000e+00> : vector<8x32xf32>
    %19 = tpu.matmul %17, %18, %cst_7 {dimension_numbers = #tpu.dot_dimension_numbers<[1], [0], [0], [1], [0, 0, 1, 1], [], []>} : vector<8x32xbf16>, vector<32x32xbf16>, vector<8x32xf32> -> vector<8x32xf32>
    %c0_8 = arith.constant 0 : index
    %c0_9 = arith.constant 0 : index
    %20 = vector.load %arg3[%c0_8, %c0_9] : memref<1x32xf32, #tpu.memory_space<vmem>>, vector<1x32xf32>
    %21 = vector.broadcast %20 : vector<1x32xf32> to vector<8x32xf32>
    %22 = arith.addf %19, %21 : vector<8x32xf32>
    %cst_10 = arith.constant 5.000000e-01 : f32
    %23 = vector.broadcast %cst_10 : f32 to vector<8x32xf32>
    %24 = arith.mulf %23, %22 : vector<8x32xf32>
    %cst_11 = arith.constant 0.707106769 : f32
    %25 = vector.broadcast %cst_11 : f32 to vector<8x32xf32>
    %26 = arith.mulf %22, %25 : vector<8x32xf32>
    %27 = math.erf %26 : vector<8x32xf32>
    %cst_12 = arith.constant 1.000000e+00 : f32
    %28 = vector.broadcast %cst_12 : f32 to vector<8x32xf32>
    %29 = arith.addf %28, %27 : vector<8x32xf32>
    %30 = arith.mulf %24, %29 : vector<8x32xf32>
    %31 = arith.truncf %30 : vector<8x32xf32> to vector<8x32xbf16>
    %c0_13 = arith.constant 0 : index
    %c0_14 = arith.constant 0 : index
    %32 = vector.load %arg4[%c0_13, %c0_14] : memref<32x16xbf16, #tpu.memory_space<vmem>>, vector<32x16xbf16>
    %cst_15 = arith.constant dense<0.000000e+00> : vector<8x16xf32>
    %33 = tpu.matmul %31, %32, %cst_15 {dimension_numbers = #tpu.dot_dimension_numbers<[1], [0], [0], [1], [0, 0, 1, 1], [], []>} : vector<8x32xbf16>, vector<32x16xbf16>, vector<8x16xf32> -> vector<8x16xf32>
    %c0_16 = arith.constant 0 : index
    %c0_17 = arith.constant 0 : index
    %34 = vector.load %arg5[%c0_16, %c0_17] : memref<1x16xf32, #tpu.memory_space<vmem>>, vector<1x16xf32>
    %35 = vector.broadcast %34 : vector<1x16xf32> to vector<8x16xf32>
    %36 = arith.addf %33, %35 : vector<8x16xf32>
    %cst_18 = arith.constant 5.000000e-01 : f32
    %37 = vector.broadcast %cst_18 : f32 to vector<8x16xf32>
    %38 = arith.mulf %37, %36 : vector<8x16xf32>
    %cst_19 = arith.constant 0.707106769 : f32
    %39 = vector.broadcast %cst_19 : f32 to vector<8x16xf32>
    %40 = arith.mulf %36, %39 : vector<8x16xf32>
    %41 = math.erf %40 : vector<8x16xf32>
    %cst_20 = arith.constant 1.000000e+00 : f32
    %42 = vector.broadcast %cst_20 : f32 to vector<8x16xf32>
    %43 = arith.addf %42, %41 : vector<8x16xf32>
    %44 = arith.mulf %38, %43 : vector<8x16xf32>
    %45 = arith.truncf %44 : vector<8x16xf32> to vector<8x16xbf16>
    %c0_21 = arith.constant 0 : index
    %c0_22 = arith.constant 0 : index
    %46 = vector.load %arg6[%c0_21, %c0_22] : memref<16x8xbf16, #tpu.memory_space<vmem>>, vector<16x8xbf16>
    %cst_23 = arith.constant dense<0.000000e+00> : vector<8x8xf32>
    %47 = tpu.matmul %45, %46, %cst_23 {dimension_numbers = #tpu.dot_dimension_numbers<[1], [0], [0], [1], [0, 0, 1, 1], [], []>} : vector<8x16xbf16>, vector<16x8xbf16>, vector<8x8xf32> -> vector<8x8xf32>
    %c0_24 = arith.constant 0 : index
    %c0_25 = arith.constant 0 : index
    %48 = vector.load %arg7[%c0_24, %c0_25] : memref<1x8xf32, #tpu.memory_space<vmem>>, vector<1x8xf32>
    %49 = vector.broadcast %48 : vector<1x8xf32> to vector<8x8xf32>
    %50 = arith.addf %47, %49 : vector<8x8xf32>
    %c0_26 = arith.constant 0 : index
    %c0_27 = arith.constant 0 : index
    %51 = vector.load %arg8[%c0_26, %c0_27] : memref<8x8xf32, #tpu.memory_space<vmem>>, vector<8x8xf32>
    tpu.vector_store %arg8[%c0_26, %c0_27], %50 {strides = array<i32>} : memref<8x8xf32, #tpu.memory_space<vmem>>, vector<8x8xf32>,
    return
  }
  func.func @transform_0(%arg0: i32) -> (i32, i32) {
    %c0_i32 = arith.constant 0 : i32
    %c0_i32_0 = arith.constant 0 : i32
    return %arg0, %c0_i32 : i32, i32
  }
  func.func @transform_1(%arg0: i32) -> (i32, i32) {
    %c0_i32 = arith.constant 0 : i32
    %c0_i32_0 = arith.constant 0 : i32
    %c0_i32_1 = arith.constant 0 : i32
    return %c0_i32, %c0_i32_0 : i32, i32
  }
  func.func @transform_2(%arg0: i32) -> (i32, i32) {
    %c0_i32 = arith.constant 0 : i32
    %c0_i32_0 = arith.constant 0 : i32
    %c0_i32_1 = arith.constant 0 : i32
    return %c0_i32, %c0_i32_0 : i32, i32
  }
  func.func @transform_3(%arg0: i32) -> (i32, i32) {
    %c0_i32 = arith.constant 0 : i32
    %c0_i32_0 = arith.constant 0 : i32
    %c0_i32_1 = arith.constant 0 : i32
    return %c0_i32, %c0_i32_0 : i32, i32
  }
  func.func @transform_4(%arg0: i32) -> (i32, i32) {
    %c0_i32 = arith.constant 0 : i32
    %c0_i32_0 = arith.constant 0 : i32
    %c0_i32_1 = arith.constant 0 : i32
    return %c0_i32, %c0_i32_0 : i32, i32
  }
  func.func @transform_5(%arg0: i32) -> (i32, i32) {
    %c0_i32 = arith.constant 0 : i32
    %c0_i32_0 = arith.constant 0 : i32
    %c0_i32_1 = arith.constant 0 : i32
    return %c0_i32, %c0_i32_0 : i32, i32
  }
  func.func @transform_6(%arg0: i32) -> (i32, i32) {
    %c0_i32 = arith.constant 0 : i32
    %c0_i32_0 = arith.constant 0 : i32
    %c0_i32_1 = arith.constant 0 : i32
    return %c0_i32, %c0_i32_0 : i32, i32
  }
  func.func @transform_7(%arg0: i32) -> (i32, i32) {
    %c0_i32 = arith.constant 0 : i32
    %c0_i32_0 = arith.constant 0 : i32
    return %arg0, %c0_i32 : i32, i32
  }
}

module attributes {stable_mosaic.version = 11 : i64} {
  func.func @mos_predictor_kernel(%arg0: i32, %arg1: memref<8x32xf32, #tpu.memory_space<vmem>>, %arg2: memref<32x32xbf16, #tpu.memory_space<vmem>>, %arg3: memref<1x32xf32, #tpu.memory_space<vmem>>, %arg4: memref<32x16xbf16, #tpu.memory_space<vmem>>, %arg5: memref<1x16xf32, #tpu.memory_space<vmem>>, %arg6: memref<16x8xbf16, #tpu.memory_space<vmem>>, %arg7: memref<1x8xf32, #tpu.memory_space<vmem>>, %arg8: memref<8x8xf32, #tpu.memory_space<vmem>>) attributes {dimension_semantics = [#tpu.dimension_semantics<parallel>], iteration_bounds = array<i64: 2>, scalar_prefetch = 0 : i64, scratch_operands = 0 : i64, tpu.core_type = #tpu.core_type<tc>, window_params = [{transform_indices = @transform_0, window_bounds = array<i64: 8, 32>}, {pipeline_mode = #tpu.pipeline_mode<synchronous>, transform_indices = @transform_1, window_bounds = array<i64: 32, 32>}, {pipeline_mode = #tpu.pipeline_mode<synchronous>, transform_indices = @transform_2, window_bounds = array<i64: 1, 32>}, {pipeline_mode = #tpu.pipeline_mode<synchronous>, transform_indices = @transform_3, window_bounds = array<i64: 32, 16>}, {pipeline_mode = #tpu.pipeline_mode<synchronous>, transform_indices = @transform_4, window_bounds = array<i64: 1, 16>}, {pipeline_mode = #tpu.pipeline_mode<synchronous>, transform_indices = @transform_5, window_bounds = array<i64: 16, 8>}, {pipeline_mode = #tpu.pipeline_mode<synchronous>, transform_indices = @transform_6, window_bounds = array<i64: 1, 8>}, {transform_indices = @transform_7, window_bounds = array<i64: 8, 8>}]} {
    %c0 = arith.constant 0 : index
    %c0_0 = arith.constant 0 : index
    %0 = vector.load %arg1[%c0, %c0_0] : memref<8x32xf32, #tpu.memory_space<vmem>>, vector<8x32xf32>
    %cst = arith.constant dense<0.000000e+00> : vector<8xf32>
    %1 = vector.multi_reduction <add>, %0, %cst [1] : vector<8x32xf32> to vector<8xf32>
    %2 = vector.shape_cast %1 : vector<8xf32> to vector<8x1xf32>
    %cst_1 = arith.constant 3.200000e+01 : f32
    %3 = vector.broadcast %cst_1 : f32 to vector<8x1xf32>
    %4 = arith.divf %2, %3 : vector<8x1xf32>
    %5 = vector.broadcast %4 : vector<8x1xf32> to vector<8x32xf32>
    %6 = arith.subf %0, %5 : vector<8x32xf32>
    %7 = arith.mulf %6, %6 : vector<8x32xf32>
    %cst_2 = arith.constant dense<0.000000e+00> : vector<8xf32>
    %8 = vector.multi_reduction <add>, %7, %cst_2 [1] : vector<8x32xf32> to vector<8xf32>
    %9 = vector.shape_cast %8 : vector<8xf32> to vector<8x1xf32>
    %cst_3 = arith.constant 3.200000e+01 : f32
    %10 = vector.broadcast %cst_3 : f32 to vector<8x1xf32>
    %11 = arith.divf %9, %10 : vector<8x1xf32>
    %cst_4 = arith.constant 9.99999974E-6 : f32
    %12 = vector.broadcast %cst_4 : f32 to vector<8x1xf32>
    %13 = arith.addf %11, %12 : vector<8x1xf32>
    %14 = math.rsqrt %13 : vector<8x1xf32>
    %15 = vector.broadcast %14 : vector<8x1xf32> to vector<8x32xf32>
    %16 = arith.mulf %6, %15 : vector<8x32xf32>
    %17 = arith.truncf %16 : vector<8x32xf32> to vector<8x32xbf16>
    %c0_5 = arith.constant 0 : index
    %c0_6 = arith.constant 0 : index
    %18 = vector.load %arg2[%c0_5, %c0_6] : memref<32x32xbf16, #tpu.memory_space<vmem>>, vector<32x32xbf16>
    %cst_7 = arith.constant dense<0.000000e+00> : vector<8x32xf32>
    %19 = tpu.matmul %17, %18, %cst_7 {dimension_numbers = #tpu.dot_dimension_numbers<[1], [0], [0], [1], [0, 0, 1, 1], [], []>} : vector<8x32xbf16>, vector<32x32xbf16>, vector<8x32xf32> -> vector<8x32xf32>
    %c0_8 = arith.constant 0 : index
    %c0_9 = arith.constant 0 : index
    %20 = vector.load %arg3[%c0_8, %c0_9] : memref<1x32xf32, #tpu.memory_space<vmem>>, vector<1x32xf32>
    %21 = vector.broadcast %20 : vector<1x32xf32> to vector<8x32xf32>
    %22 = arith.addf %19, %21 : vector<8x32xf32>
    %cst_10 = arith.constant 5.000000e-01 : f32
    %23 = vector.broadcast %cst_10 : f32 to vector<8x32xf32>
    %24 = arith.mulf %23, %22 : vector<8x32xf32>
    %cst_11 = arith.constant 0.707106769 : f32
    %25 = vector.broadcast %cst_11 : f32 to vector<8x32xf32>
    %26 = arith.mulf %22, %25 : vector<8x32xf32>
    %27 = math.erf %26 : vector<8x32xf32>
    %cst_12 = arith.constant 1.000000e+00 : f32
    %28 = vector.broadcast %cst_12 : f32 to vector<8x32xf32>
    %29 = arith.addf %28, %27 : vector<8x32xf32>
    %30 = arith.mulf %24, %29 : vector<8x32xf32>
    %31 = arith.truncf %30 : vector<8x32xf32> to vector<8x32xbf16>
    %c0_13 = arith.constant 0 : index
    %c0_14 = arith.constant 0 : index
    %32 = vector.load %arg4[%c0_13, %c0_14] : memref<32x16xbf16, #tpu.memory_space<vmem>>, vector<32x16xbf16>
    %cst_15 = arith.constant dense<0.000000e+00> : vector<8x16xf32>
    %33 = tpu.matmul %31, %32, %cst_15 {dimension_numbers = #tpu.dot_dimension_numbers<[1], [0], [0], [1], [0, 0, 1, 1], [], []>} : vector<8x32xbf16>, vector<32x16xbf16>, vector<8x16xf32> -> vector<8x16xf32>
    %c0_16 = arith.constant 0 : index
    %c0_17 = arith.constant 0 : index
    %34 = vector.load %arg5[%c0_16, %c0_17] : memref<1x16xf32, #tpu.memory_space<vmem>>, vector<1x16xf32>
    %35 = vector.broadcast %34 : vector<1x16xf32> to vector<8x16xf32>
    %36 = arith.addf %33, %35 : vector<8x16xf32>
    %cst_18 = arith.constant 5.000000e-01 : f32
    %37 = vector.broadcast %cst_18 : f32 to vector<8x16xf32>
    %38 = arith.mulf %37, %36 : vector<8x16xf32>
    %cst_19 = arith.constant 0.707106769 : f32
    %39 = vector.broadcast %cst_19 : f32 to vector<8x16xf32>
    %40 = arith.mulf %36, %39 : vector<8x16xf32>
    %41 = math.erf %40 : vector<8x16xf32>
    %cst_20 = arith.constant 1.000000e+00 : f32
    %42 = vector.broadcast %cst_20 : f32 to vector<8x16xf32>
    %43 = arith.addf %42, %41 : vector<8x16xf32>
    %44 = arith.mulf %38, %43 : vector<8x16xf32>
    %45 = arith.truncf %44 : vector<8x16xf32> to vector<8x16xbf16>
    %c0_21 = arith.constant 0 : index
    %c0_22 = arith.constant 0 : index
    %46 = vector.load %arg6[%c0_21, %c0_22] : memref<16x8xbf16, #tpu.memory_space<vmem>>, vector<16x8xbf16>
    %cst_23 = arith.constant dense<0.000000e+00> : vector<8x8xf32>
    %47 = tpu.matmul %45, %46, %cst_23 {dimension_numbers = #tpu.dot_dimension_numbers<[1], [0], [0], [1], [0, 0, 1, 1], [], []>} : vector<8x16xbf16>, vector<16x8xbf16>, vector<8x8xf32> -> vector<8x8xf32>
    %c0_24 = arith.constant 0 : index
    %c0_25 = arith.constant 0 : index
    %48 = vector.load %arg7[%c0_24, %c0_25] : memref<1x8xf32, #tpu.memory_space<vmem>>, vector<1x8xf32>
    %49 = vector.broadcast %48 : vector<1x8xf32> to vector<8x8xf32>
    %50 = arith.addf %47, %49 : vector<8x8xf32>
    %c0_26 = arith.constant 0 : index
    %c0_27 = arith.constant 0 : index
    %51 = vector.load %arg8[%c0_26, %c0_27] : memref<8x8xf32, #tpu.memory_space<vmem>>, vector<8x8xf32>
    tpu.vector_store %arg8[%c0_26, %c0_27], %50 {strides = array<i32>} : memref<8x8xf32, #tpu.memory_space<vmem>>, vector<8x8xf32>,
    return
  }
  func.func @transform_0(%arg0: i32) -> (i32, i32) {
    %c0_i32 = arith.constant 0 : i32
    %c0_i32_0 = arith.constant 0 : i32
    return %arg0, %c0_i32 : i32, i32
  }
  func.func @transform_1(%arg0: i32) -> (i32, i32) {
    %c0_i32 = arith.constant 0 : i32
    %c0_i32_0 = arith.constant 0 : i32
    %c0_i32_1 = arith.constant 0 : i32
    return %c0_i32, %c0_i32_0 : i32, i32
  }
  func.func @transform_2(%arg0: i32) -> (i32, i32) {
    %c0_i32 = arith.constant 0 : i32
    %c0_i32_0 = arith.constant 0 : i32
    %c0_i32_1 = arith.constant 0 : i32
    return %c0_i32, %c0_i32_0 : i32, i32
  }
  func.func @transform_3(%arg0: i32) -> (i32, i32) {
    %c0_i32 = arith.constant 0 : i32
    %c0_i32_0 = arith.constant 0 : i32
    %c0_i32_1 = arith.constant 0 : i32
    return %c0_i32, %c0_i32_0 : i32, i32
  }
  func.func @transform_4(%arg0: i32) -> (i32, i32) {
    %c0_i32 = arith.constant 0 : i32
    %c0_i32_0 = arith.constant 0 : i32
    %c0_i32_1 = arith.constant 0 : i32
    return %c0_i32, %c0_i32_0 : i32, i32
  }
  func.func @transform_5(%arg0: i32) -> (i32, i32) {
    %c0_i32 = arith.constant 0 : i32
    %c0_i32_0 = arith.constant 0 : i32
    %c0_i32_1 = arith.constant 0 : i32
    return %c0_i32, %c0_i32_0 : i32, i32
  }
  func.func @transform_6(%arg0: i32) -> (i32, i32) {
    %c0_i32 = arith.constant 0 : i32
    %c0_i32_0 = arith.constant 0 : i32
    %c0_i32_1 = arith.constant 0 : i32
    return %c0_i32, %c0_i32_0 : i32, i32
  }
  func.func @transform_7(%arg0: i32) -> (i32, i32) {
    %c0_i32 = arith.constant 0 : i32
    %c0_i32_0 = arith.constant 0 : i32
    return %arg0, %c0_i32 : i32, i32
  }
}

</mosaic_0001>

<bundles_post_ra>
// kernel: tpu_custom_call.1
= control target key start
LH: loop header
LB: loop body
LE: loop exit
PB: predicated region body
PF: predicated region fallthrough
CT: control target
= control target key end

     0   :  { %s661_s24 = smov 0   ;;  %s713_s0 = inlined_call_operand.vmem [shape: f32[13,32], index: 0, kind: input, shape index: {}]   ;;  %s714_s1 = inlined_call_operand.vmem [shape: bf16[32,32], index: 1, kind: input, shape index: {}]   ;;  %s715_s2 = inlined_call_operand.vmem [shape: f32[1,32], index: 2, kind: input, shape index: {}]   ;;  %s716_s3 = inlined_call_operand.vmem [shape: bf16[32,16], index: 3, kind: input, shape index: {}]   ;;  %s717_s4 = inlined_call_operand.vmem [shape: f32[1,16], index: 4, kind: input, shape index: {}]   ;;  %s718_s5 = inlined_call_operand.vmem [shape: bf16[16,8], index: 5, kind: input, shape index: {}]   ;;  %s719_s6 = inlined_call_operand.vmem [shape: f32[1,8], index: 6, kind: input, shape index: {}]   ;;  %s720_s7 = inlined_call_operand.vmem [shape: f32[13,8], index: 7, kind: output, shape index: {}]  }
   0x1 LB: > { %s553_s25 = sadd.s32 4294967295, %s618_s24   ;;  %p557_p0 = scmp.ge.s32.totalorder %s618_s24, 1  ;;  %s618_s24 = sphi %s661_s24, %s17_s24  }
   0x2   : > { %p236_p1 = scmp.lt.s32.totalorder %s618_s24, 3 }
   0x4   : > { %p237_p2 = pnand %p557_p0, %p236_p1 }
   0x5   : > { %p266_p3 = scmp.lt.s32.totalorder (!%p237_p2), %s553_s25, 1 }
   0x6   : > { %240 = sbr.rel (%p237_p2) target bundleno = 783 (0x30f), region = 48 }
   0xb   : > { %s722_s25 = smov (!%p266_p3, %s553_s25), 1  ;;  %vm276_vm0 = vcmask 261120   ;;  %v620_v2 = vmov 32.0   ;;  %v588_v14 = vld [vmem:[%s714_s1 + $0x8] sm:$0xff]  ;;  %v587_v15 = vld [vmem:[%s714_s1] sm:$0xff]  ;;  %vm481_vm13 = vcmask 130048  }
   0xc   : > { %s558_s26 = sshll.u32 %s722_s25, 3  ;;  %604 = vrcp.f32 %v620_v2  ;;  %336 = vmatpush.bf16.msra.mxu0 %v588_v14  ;;  %v601_v28 = vld [vmem:[%s715_s2] ss:$0 sm:$0xff]  ;;  %v590_v41 = vld [vmem:[%s716_s3 + $0x8] sm:$0xff]  ;;  %vm498_vm14 = vcmask 64512  }
   0xd   : > { %s269_s29 = scalar_lea.vmem %s713_s0, %s558_s26  ;;  %417 = vmatpush.bf16.msra.mxu1 %v590_v41  ;;  %v589_v44 = vld [vmem:[%s716_s3] sm:$0xff]  ;;  %s273_s28 = scalar_lea.vmem %s720_s7, %s558_s26 }
   0xe   : > { %v275_v0 = vld [vmem:[%s269_s29] sm:$0xff] }
   0xf   : > { %v277_v1 = vsel %vm276_vm0, %v275_v0, 0.0 }
  0x10   : > { %278 = vadd.xlane.f32.xlu0 %v277_v1  ;;  %337 = vmatpush.bf16.msra.mxu0 %v587_v15 }
  0x11   : > { %418 = vmatpush.bf16.msra.mxu1 %v589_v44 }
  0x12   : > { %v605_v3 = vpop.eup %604 }
  0x13   : > { %v281_v4 = vmul.f32 32.0, %v605_v3  ;;  %vm285_vm1 = vweird.f32 %v605_v3 }
  0x15   : > { %v282_v5 = vsub.f32 1.0, %v281_v4 }
  0x17   : > { %v283_v6 = vmul.f32 %v605_v3, %v282_v5 }
  0x19   : > { %v284_v7 = vadd.f32 %v605_v3, %v283_v6 }
  0x1b   : > { %v286_v8 = vsel %vm285_vm1, %v605_v3, %v284_v7 }
  0x83   : > { %v279_v9 = vpop.xlane.xlu0 %278 }
  0x84   : > { %v287_v10 = vmul.f32 %v286_v8, %v279_v9 }
  0x86   : > { %v288_v11 = vsub.f32 %v275_v0, %v287_v10  ;;  %v602_v10 = vld [vmem:[%s717_s4] ss:$0 sm:$0xff] }
  0x88   : > { %v289_v12 = vmul.f32 %v288_v11, %v288_v11 }
  0x8a   : > { %v290_v13 = vsel %vm276_vm0, %v289_v12, 0.0 }
  0x8b   : > { %291 = vadd.xlane.f32.xlu0 %v290_v13 }
  0xfe   : > { %v292_v16 = vpop.xlane.xlu0 %291 }
  0xff   : > { %v293_v17 = vmul.f32 %v292_v16, %v286_v8 }
 0x101   : > { %v294_v18 = vadd.f32 1e-05, %v293_v17 }
 0x103   : > { %606 = vrsqrt.f32 %v294_v18  ;;  %vm301_vm3 = vweird.f32 %v294_v18 }
 0x109   : > { %v607_v19 = vpop.eup %606 }
 0x10a   : > { %v296_v20 = vmul.f32 %v607_v19, %v294_v18  ;;  %vm302_vm2 = vweird.f32 %v607_v19 }
 0x10b   : > { %vm303_vm4 = vmor %vm301_vm3, %vm302_vm2 }
 0x10c   : > { %v297_v21 = vmul.f32 %v607_v19, %v296_v20 }
 0x10e   : > { %v298_v22 = vmul.f32 0.5, %v297_v21 }
 0x110   : > { %v299_v23 = vsub.f32 1.5, %v298_v22 }
 0x112   : > { %v300_v24 = vmul.f32 %v607_v19, %v299_v23  ;;  %v591_v23 = vld [vmem:[%s718_s5] sm:$0xff] }
 0x113   : > { %492 = vmatpush.bf16.msra.mxu2 %v591_v23 }
 0x114   : > { %v304_v25 = vsel %vm303_vm4, %v607_v19, %v300_v24 }
 0x115   : > { %v305_v26 = vmul.f32 %v304_v25, %v288_v11 }
 0x117   : > { %v306_v27 = vpack.c.bf16 %v305_v26, %v305_v26 }
 0x119   : > { %568 = vmatmul.msk.bf16.vlgmr.msra.gmra.mxu0 %vm276_vm0, %v306_v27 }
 0x196   : > { %v339_v29 = vpop.f32.mrf.mxu0 }
 0x197   : > { %v340_v30 = vadd.f32 %v601_v28, %v339_v29 }
 0x199   : > { %v344_v31 = vmul.f32 0.70710677, %v340_v30  ;;  %v343_v6 = vmul.f32 0.5, %v340_v30 }
 0x19b   : > { %v345_v32 = vmul.f32 %v344_v31, %v344_v31 }
 0x19d   : > { %v346_v33 = vmin.f32 %v345_v32, 16.0 }
 0x19e   : > { %v341_v34 = vpop.f32.mrf.mxu0 }
 0x19f   : > { %v347_v35 = vmul.f32 2.1237322e-06, %v346_v33  ;;  %v358_v36 = vmul.f32 3.8918573e-05, %v346_v33 }
 0x1a1   : > { %v348_v37 = vadd.f32 0.00028619796, %v347_v35  ;;  %v359_v38 = vadd.f32 0.001143296, %v358_v36 }
 0x1a3   : > { %v349_v39 = vmul.f32 %v348_v37, %v346_v33  ;;  %v360_v40 = vmul.f32 %v359_v38, %v346_v33 }
 0x1a5   : > { %v361_v42 = vadd.f32 0.014752088, %v360_v40  ;;  %v350_v43 = vadd.f32 0.0036580483, %v349_v39 }
 0x1a7   : > { %v362_v45 = vmul.f32 %v361_v42, %v346_v33  ;;  %v351_v47 = vmul.f32 %v350_v43, %v346_v33 }
 0x1a9   : > { %v363_v46 = vadd.f32 0.112945676, %v362_v45  ;;  %v352_v50 = vadd.f32 0.05243302, %v351_v47 }
 0x1ab   : > { %v364_v48 = vmul.f32 %v363_v46, %v346_v33  ;;  %v353_v53 = vmul.f32 %v352_v50, %v346_v33 }
 0x1ad   : > { %v365_v49 = vadd.f32 0.4994258, %v364_v48  ;;  %v354_v54 = vadd.f32 0.18741608, %v353_v53 }
 0x1af   : > { %v366_v51 = vmul.f32 %v365_v49, %v346_v33  ;;  %v355_v56 = vmul.f32 %v354_v54, %v346_v33 }
 0x1b1   : > { %v367_v52 = vadd.f32 1.0, %v366_v51  ;;  %v356_v60 = vadd.f32 1.1283791, %v355_v56 }
 0x1b3   : > { %608 = vrcp.f32 %v367_v52  ;;  %v379_v59 = vand.u32 2147483648, %v367_v52  ;;  %v377_v62 = vand.u32 2147483647, %v367_v52  ;;  %vm373_vm6 = vweird.f32 %v367_v52 }
 0x1b4   : > { %v357_v1 = vmul.f32 %v356_v60, %v344_v31 }
 0x1b5   : > { %v380_v0 = vor.u32 1.1754944e-38, %v379_v59  ;;  %vm378_vm8 = vcmp.eq.f32.partialorder %v377_v62, 8.507059e+37 }
 0x1b9   : > { %v609_v55 = vpop.eup %608 }
 0x1ba   : > { %v369_v57 = vmul.f32 %v609_v55, %v367_v52  ;;  %vm374_vm5 = vweird.f32 %v609_v55 }
 0x1bb   : > { %vm375_vm7 = vmor %vm373_vm6, %vm374_vm5 }
 0x1bc   : > { %v370_v58 = vsub.f32 1.0, %v369_v57 }
 0x1be   : > { %v371_v61 = vmul.f32 %v609_v55, %v370_v58 }
 0x1c0   : > { %v372_v63 = vadd.f32 %v609_v55, %v371_v61 }
 0x1c2   : > { %v376_v2 = vsel %vm375_vm7, %v609_v55, %v372_v63  ;;  %v603_v55 = vld [vmem:[%s719_s6] ss:$0 sm:$0xff] }
 0x1c3   : > { %v381_v3 = vsel %vm378_vm8, %v380_v0, %v376_v2 }
 0x1c4   : > { %v382_v4 = vmul.f32 %v381_v3, %v357_v1 }
 0x1c6   : > { %v569_v5 = vclamps-f32 %v382_v4, 1.0 }
 0x1c8   : > { %v385_v7 = vadd.f32 1.0, %v569_v5 }
 0x1ca   : > { %v386_v8 = vmul.f32 %v385_v7, %v343_v6 }
 0x1cc   : > { %v387_v9 = vpack.c.bf16 %v386_v8, %v386_v8 }
 0x1ce   : > { %578 = vmatmul.msk.bf16.vlgmr.msra.gmra.mxu1 %vm276_vm0, %v387_v9 }
 0x24b   : > { %v420_v11 = vpop.f32.mrf.mxu1 }
 0x24c   : > { %v421_v12 = vadd.f32 %v602_v10, %v420_v11 }
 0x24e   : > { %v425_v13 = vmul.f32 0.70710677, %v421_v12  ;;  %v424_v51 = vmul.f32 0.5, %v421_v12 }
 0x250   : > { %v426_v14 = vmul.f32 %v425_v13, %v425_v13 }
 0x252   : > { %v427_v15 = vmin.f32 %v426_v14, 16.0 }
 0x253   : > { %v422_v16 = vpop.f32.mrf.mxu1 }
 0x254   : > { %v428_v17 = vmul.f32 2.1237322e-06, %v427_v15  ;;  %v439_v18 = vmul.f32 3.8918573e-05, %v427_v15 }
 0x256   : > { %v429_v19 = vadd.f32 0.00028619796, %v428_v17  ;;  %v440_v20 = vadd.f32 0.001143296, %v439_v18 }
 0x258   : > { %v430_v21 = vmul.f32 %v429_v19, %v427_v15  ;;  %v441_v22 = vmul.f32 %v440_v20, %v427_v15 }
 0x25a   : > { %v442_v24 = vadd.f32 0.014752088, %v441_v22  ;;  %v431_v25 = vadd.f32 0.0036580483, %v430_v21 }
 0x25c   : > { %v443_v26 = vmul.f32 %v442_v24, %v427_v15  ;;  %v432_v28 = vmul.f32 %v431_v25, %v427_v15 }
 0x25e   : > { %v444_v27 = vadd.f32 0.112945676, %v443_v26  ;;  %v433_v31 = vadd.f32 0.05243302, %v432_v28 }
 0x260   : > { %v445_v29 = vmul.f32 %v444_v27, %v427_v15  ;;  %v434_v34 = vmul.f32 %v433_v31, %v427_v15 }
 0x262   : > { %v446_v30 = vadd.f32 0.4994258, %v445_v29  ;;  %v435_v35 = vadd.f32 0.18741608, %v434_v34 }
 0x264   : > { %v447_v32 = vmul.f32 %v446_v30, %v427_v15  ;;  %v436_v37 = vmul.f32 %v435_v35, %v427_v15 }
 0x266   : > { %v448_v33 = vadd.f32 1.0, %v447_v32  ;;  %v437_v41 = vadd.f32 1.1283791, %v436_v37 }
 0x268   : > { %610 = vrcp.f32 %v448_v33  ;;  %v460_v40 = vand.u32 2147483648, %v448_v33  ;;  %v458_v43 = vand.u32 2147483647, %v448_v33  ;;  %vm454_vm10 = vweird.f32 %v448_v33 }
 0x269   : > { %v438_v46 = vmul.f32 %v437_v41, %v425_v13 }
 0x26a   : > { %v461_v45 = vor.u32 1.1754944e-38, %v460_v40  ;;  %vm459_vm12 = vcmp.eq.f32.partialorder %v458_v43, 8.507059e+37 }
 0x26e   : > { %v611_v36 = vpop.eup %610 }
 0x26f   : > { %v450_v38 = vmul.f32 %v611_v36, %v448_v33  ;;  %vm455_vm9 = vweird.f32 %v611_v36 }
 0x270   : > { %vm456_vm11 = vmor %vm454_vm10, %vm455_vm9 }
 0x271   : > { %v451_v39 = vsub.f32 1.0, %v450_v38 }
 0x273   : > { %v452_v42 = vmul.f32 %v611_v36, %v451_v39 }
 0x275   : > { %v453_v44 = vadd.f32 %v611_v36, %v452_v42 }
 0x277   : > { %v457_v47 = vsel %vm456_vm11, %v611_v36, %v453_v44 }
 0x278   : > { %v462_v48 = vsel %vm459_vm12, %v461_v45, %v457_v47 }
 0x279   : > { %v463_v49 = vmul.f32 %v462_v48, %v438_v46 }
 0x27b   : > { %v579_v50 = vclamps-f32 %v463_v49, 1.0 }
 0x27d   : > { %v466_v52 = vadd.f32 1.0, %v579_v50 }
 0x27f   : > { %v467_v53 = vmul.f32 %v466_v52, %v424_v51 }
 0x281   : > { %v468_v54 = vpack.c.bf16 %v467_v53, %v467_v53 }
 0x283   : > { %584 = vmatmul.msk.bf16.vlgmr.msra.gmra.mxu2 %vm481_vm13, %v468_v54 }
 0x306   : > { %v494_v56 = vpop.f32.mrf.mxu2 }
 0x307   : > { %v495_v57 = vadd.f32 %v603_v55, %v494_v56 }
 0x309   : > { %499 = vst.msk [vmem:[%s273_s28] sm:$0xff] %vm498_vm14, %v495_v57 }
 0x30e   : > { %v496_v58 = vpop.f32.mrf.mxu2 }
 0x30f PF: > { %s17_s24 = sadd.s32 1, %s618_s24  }
 0x310   : > { %p14_p4 = scmp.ge.s32.totalorder %s17_s24, 4  }
 0x312   :  { %16 = sbr.rel (!%p14_p4) target bundleno = 1 (0x1), region = 78 }

// kernel: tpu_custom_call.1
= control target key start
LH: loop header
LB: loop body
LE: loop exit
PB: predicated region body
PF: predicated region fallthrough
CT: control target
= control target key end

     0   :  { %s661_s24 = smov 0   ;;  %s713_s0 = inlined_call_operand.vmem [shape: f32[13,32], index: 0, kind: input, shape index: {}]   ;;  %s714_s1 = inlined_call_operand.vmem [shape: bf16[32,32], index: 1, kind: input, shape index: {}]   ;;  %s715_s2 = inlined_call_operand.vmem [shape: f32[1,32], index: 2, kind: input, shape index: {}]   ;;  %s716_s3 = inlined_call_operand.vmem [shape: bf16[32,16], index: 3, kind: input, shape index: {}]   ;;  %s717_s4 = inlined_call_operand.vmem [shape: f32[1,16], index: 4, kind: input, shape index: {}]   ;;  %s718_s5 = inlined_call_operand.vmem [shape: bf16[16,8], index: 5, kind: input, shape index: {}]   ;;  %s719_s6 = inlined_call_operand.vmem [shape: f32[1,8], index: 6, kind: input, shape index: {}]   ;;  %s720_s7 = inlined_call_operand.vmem [shape: f32[13,8], index: 7, kind: output, shape index: {}]  }
   0x1 LB: > { %s553_s25 = sadd.s32 4294967295, %s618_s24   ;;  %p557_p0 = scmp.ge.s32.totalorder %s618_s24, 1  ;;  %s618_s24 = sphi %s661_s24, %s17_s24  }
   0x2   : > { %p236_p1 = scmp.lt.s32.totalorder %s618_s24, 3 }
   0x4   : > { %p237_p2 = pnand %p557_p0, %p236_p1 }
   0x5   : > { %p266_p3 = scmp.lt.s32.totalorder (!%p237_p2), %s553_s25, 1 }
   0x6   : > { %240 = sbr.rel (%p237_p2) target bundleno = 783 (0x30f), region = 48 }
   0xb   : > { %s722_s25 = smov (!%p266_p3, %s553_s25), 1  ;;  %vm276_vm0 = vcmask 261120   ;;  %v620_v2 = vmov 32.0   ;;  %v588_v14 = vld [vmem:[%s714_s1 + $0x8] sm:$0xff]  ;;  %v587_v15 = vld [vmem:[%s714_s1] sm:$0xff]  ;;  %vm481_vm13 = vcmask 130048  }
   0xc   : > { %s558_s26 = sshll.u32 %s722_s25, 3  ;;  %604 = vrcp.f32 %v620_v2  ;;  %336 = vmatpush.bf16.msra.mxu0 %v588_v14  ;;  %v601_v28 = vld [vmem:[%s715_s2] ss:$0 sm:$0xff]  ;;  %v590_v41 = vld [vmem:[%s716_s3 + $0x8] sm:$0xff]  ;;  %vm498_vm14 = vcmask 64512  }
   0xd   : > { %s269_s29 = scalar_lea.vmem %s713_s0, %s558_s26  ;;  %417 = vmatpush.bf16.msra.mxu1 %v590_v41  ;;  %v589_v44 = vld [vmem:[%s716_s3] sm:$0xff]  ;;  %s273_s28 = scalar_lea.vmem %s720_s7, %s558_s26 }
   0xe   : > { %v275_v0 = vld [vmem:[%s269_s29] sm:$0xff] }
   0xf   : > { %v277_v1 = vsel %vm276_vm0, %v275_v0, 0.0 }
  0x10   : > { %278 = vadd.xlane.f32.xlu0 %v277_v1  ;;  %337 = vmatpush.bf16.msra.mxu0 %v587_v15 }
  0x11   : > { %418 = vmatpush.bf16.msra.mxu1 %v589_v44 }
  0x12   : > { %v605_v3 = vpop.eup %604 }
  0x13   : > { %v281_v4 = vmul.f32 32.0, %v605_v3  ;;  %vm285_vm1 = vweird.f32 %v605_v3 }
  0x15   : > { %v282_v5 = vsub.f32 1.0, %v281_v4 }
  0x17   : > { %v283_v6 = vmul.f32 %v605_v3, %v282_v5 }
  0x19   : > { %v284_v7 = vadd.f32 %v605_v3, %v283_v6 }
  0x1b   : > { %v286_v8 = vsel %vm285_vm1, %v605_v3, %v284_v7 }
  0x83   : > { %v279_v9 = vpop.xlane.xlu0 %278 }
  0x84   : > { %v287_v10 = vmul.f32 %v286_v8, %v279_v9 }
  0x86   : > { %v288_v11 = vsub.f32 %v275_v0, %v287_v10  ;;  %v602_v10 = vld [vmem:[%s717_s4] ss:$0 sm:$0xff] }
  0x88   : > { %v289_v12 = vmul.f32 %v288_v11, %v288_v11 }
  0x8a   : > { %v290_v13 = vsel %vm276_vm0, %v289_v12, 0.0 }
  0x8b   : > { %291 = vadd.xlane.f32.xlu0 %v290_v13 }
  0xfe   : > { %v292_v16 = vpop.xlane.xlu0 %291 }
  0xff   : > { %v293_v17 = vmul.f32 %v292_v16, %v286_v8 }
 0x101   : > { %v294_v18 = vadd.f32 1e-05, %v293_v17 }
 0x103   : > { %606 = vrsqrt.f32 %v294_v18  ;;  %vm301_vm3 = vweird.f32 %v294_v18 }
 0x109   : > { %v607_v19 = vpop.eup %606 }
 0x10a   : > { %v296_v20 = vmul.f32 %v607_v19, %v294_v18  ;;  %vm302_vm2 = vweird.f32 %v607_v19 }
 0x10b   : > { %vm303_vm4 = vmor %vm301_vm3, %vm302_vm2 }
 0x10c   : > { %v297_v21 = vmul.f32 %v607_v19, %v296_v20 }
 0x10e   : > { %v298_v22 = vmul.f32 0.5, %v297_v21 }
 0x110   : > { %v299_v23 = vsub.f32 1.5, %v298_v22 }
 0x112   : > { %v300_v24 = vmul.f32 %v607_v19, %v299_v23  ;;  %v591_v23 = vld [vmem:[%s718_s5] sm:$0xff] }
 0x113   : > { %492 = vmatpush.bf16.msra.mxu2 %v591_v23 }
 0x114   : > { %v304_v25 = vsel %vm303_vm4, %v607_v19, %v300_v24 }
 0x115   : > { %v305_v26 = vmul.f32 %v304_v25, %v288_v11 }
 0x117   : > { %v306_v27 = vpack.c.bf16 %v305_v26, %v305_v26 }
 0x119   : > { %568 = vmatmul.msk.bf16.vlgmr.msra.gmra.mxu0 %vm276_vm0, %v306_v27 }
 0x196   : > { %v339_v29 = vpop.f32.mrf.mxu0 }
 0x197   : > { %v340_v30 = vadd.f32 %v601_v28, %v339_v29 }
 0x199   : > { %v344_v31 = vmul.f32 0.70710677, %v340_v30  ;;  %v343_v6 = vmul.f32 0.5, %v340_v30 }
 0x19b   : > { %v345_v32 = vmul.f32 %v344_v31, %v344_v31 }
 0x19d   : > { %v346_v33 = vmin.f32 %v345_v32, 16.0 }
 0x19e   : > { %v341_v34 = vpop.f32.mrf.mxu0 }
 0x19f   : > { %v347_v35 = vmul.f32 2.1237322e-06, %v346_v33  ;;  %v358_v36 = vmul.f32 3.8918573e-05, %v346_v33 }
 0x1a1   : > { %v348_v37 = vadd.f32 0.00028619796, %v347_v35  ;;  %v359_v38 = vadd.f32 0.001143296, %v358_v36 }
 0x1a3   : > { %v349_v39 = vmul.f32 %v348_v37, %v346_v33  ;;  %v360_v40 = vmul.f32 %v359_v38, %v346_v33 }
 0x1a5   : > { %v361_v42 = vadd.f32 0.014752088, %v360_v40  ;;  %v350_v43 = vadd.f32 0.0036580483, %v349_v39 }
 0x1a7   : > { %v362_v45 = vmul.f32 %v361_v42, %v346_v33  ;;  %v351_v47 = vmul.f32 %v350_v43, %v346_v33 }
 0x1a9   : > { %v363_v46 = vadd.f32 0.112945676, %v362_v45  ;;  %v352_v50 = vadd.f32 0.05243302, %v351_v47 }
 0x1ab   : > { %v364_v48 = vmul.f32 %v363_v46, %v346_v33  ;;  %v353_v53 = vmul.f32 %v352_v50, %v346_v33 }
 0x1ad   : > { %v365_v49 = vadd.f32 0.4994258, %v364_v48  ;;  %v354_v54 = vadd.f32 0.18741608, %v353_v53 }
 0x1af   : > { %v366_v51 = vmul.f32 %v365_v49, %v346_v33  ;;  %v355_v56 = vmul.f32 %v354_v54, %v346_v33 }
 0x1b1   : > { %v367_v52 = vadd.f32 1.0, %v366_v51  ;;  %v356_v60 = vadd.f32 1.1283791, %v355_v56 }
 0x1b3   : > { %608 = vrcp.f32 %v367_v52  ;;  %v379_v59 = vand.u32 2147483648, %v367_v52  ;;  %v377_v62 = vand.u32 2147483647, %v367_v52  ;;  %vm373_vm6 = vweird.f32 %v367_v52 }
 0x1b4   : > { %v357_v1 = vmul.f32 %v356_v60, %v344_v31 }
 0x1b5   : > { %v380_v0 = vor.u32 1.1754944e-38, %v379_v59  ;;  %vm378_vm8 = vcmp.eq.f32.partialorder %v377_v62, 8.507059e+37 }
 0x1b9   : > { %v609_v55 = vpop.eup %608 }
 0x1ba   : > { %v369_v57 = vmul.f32 %v609_v55, %v367_v52  ;;  %vm374_vm5 = vweird.f32 %v609_v55 }
 0x1bb   : > { %vm375_vm7 = vmor %vm373_vm6, %vm374_vm5 }
 0x1bc   : > { %v370_v58 = vsub.f32 1.0, %v369_v57 }
 0x1be   : > { %v371_v61 = vmul.f32 %v609_v55, %v370_v58 }
 0x1c0   : > { %v372_v63 = vadd.f32 %v609_v55, %v371_v61 }
 0x1c2   : > { %v376_v2 = vsel %vm375_vm7, %v609_v55, %v372_v63  ;;  %v603_v55 = vld [vmem:[%s719_s6] ss:$0 sm:$0xff] }
 0x1c3   : > { %v381_v3 = vsel %vm378_vm8, %v380_v0, %v376_v2 }
 0x1c4   : > { %v382_v4 = vmul.f32 %v381_v3, %v357_v1 }
 0x1c6   : > { %v569_v5 = vclamps-f32 %v382_v4, 1.0 }
 0x1c8   : > { %v385_v7 = vadd.f32 1.0, %v569_v5 }
 0x1ca   : > { %v386_v8 = vmul.f32 %v385_v7, %v343_v6 }
 0x1cc   : > { %v387_v9 = vpack.c.bf16 %v386_v8, %v386_v8 }
 0x1ce   : > { %578 = vmatmul.msk.bf16.vlgmr.msra.gmra.mxu1 %vm276_vm0, %v387_v9 }
 0x24b   : > { %v420_v11 = vpop.f32.mrf.mxu1 }
 0x24c   : > { %v421_v12 = vadd.f32 %v602_v10, %v420_v11 }
 0x24e   : > { %v425_v13 = vmul.f32 0.70710677, %v421_v12  ;;  %v424_v51 = vmul.f32 0.5, %v421_v12 }
 0x250   : > { %v426_v14 = vmul.f32 %v425_v13, %v425_v13 }
 0x252   : > { %v427_v15 = vmin.f32 %v426_v14, 16.0 }
 0x253   : > { %v422_v16 = vpop.f32.mrf.mxu1 }
 0x254   : > { %v428_v17 = vmul.f32 2.1237322e-06, %v427_v15  ;;  %v439_v18 = vmul.f32 3.8918573e-05, %v427_v15 }
 0x256   : > { %v429_v19 = vadd.f32 0.00028619796, %v428_v17  ;;  %v440_v20 = vadd.f32 0.001143296, %v439_v18 }
 0x258   : > { %v430_v21 = vmul.f32 %v429_v19, %v427_v15  ;;  %v441_v22 = vmul.f32 %v440_v20, %v427_v15 }
 0x25a   : > { %v442_v24 = vadd.f32 0.014752088, %v441_v22  ;;  %v431_v25 = vadd.f32 0.0036580483, %v430_v21 }
 0x25c   : > { %v443_v26 = vmul.f32 %v442_v24, %v427_v15  ;;  %v432_v28 = vmul.f32 %v431_v25, %v427_v15 }
 0x25e   : > { %v444_v27 = vadd.f32 0.112945676, %v443_v26  ;;  %v433_v31 = vadd.f32 0.05243302, %v432_v28 }
 0x260   : > { %v445_v29 = vmul.f32 %v444_v27, %v427_v15  ;;  %v434_v34 = vmul.f32 %v433_v31, %v427_v15 }
 0x262   : > { %v446_v30 = vadd.f32 0.4994258, %v445_v29  ;;  %v435_v35 = vadd.f32 0.18741608, %v434_v34 }
 0x264   : > { %v447_v32 = vmul.f32 %v446_v30, %v427_v15  ;;  %v436_v37 = vmul.f32 %v435_v35, %v427_v15 }
 0x266   : > { %v448_v33 = vadd.f32 1.0, %v447_v32  ;;  %v437_v41 = vadd.f32 1.1283791, %v436_v37 }
 0x268   : > { %610 = vrcp.f32 %v448_v33  ;;  %v460_v40 = vand.u32 2147483648, %v448_v33  ;;  %v458_v43 = vand.u32 2147483647, %v448_v33  ;;  %vm454_vm10 = vweird.f32 %v448_v33 }
 0x269   : > { %v438_v46 = vmul.f32 %v437_v41, %v425_v13 }
 0x26a   : > { %v461_v45 = vor.u32 1.1754944e-38, %v460_v40  ;;  %vm459_vm12 = vcmp.eq.f32.partialorder %v458_v43, 8.507059e+37 }
 0x26e   : > { %v611_v36 = vpop.eup %610 }
 0x26f   : > { %v450_v38 = vmul.f32 %v611_v36, %v448_v33  ;;  %vm455_vm9 = vweird.f32 %v611_v36 }
 0x270   : > { %vm456_vm11 = vmor %vm454_vm10, %vm455_vm9 }
 0x271   : > { %v451_v39 = vsub.f32 1.0, %v450_v38 }
 0x273   : > { %v452_v42 = vmul.f32 %v611_v36, %v451_v39 }
 0x275   : > { %v453_v44 = vadd.f32 %v611_v36, %v452_v42 }
 0x277   : > { %v457_v47 = vsel %vm456_vm11, %v611_v36, %v453_v44 }
 0x278   : > { %v462_v48 = vsel %vm459_vm12, %v461_v45, %v457_v47 }
 0x279   : > { %v463_v49 = vmul.f32 %v462_v48, %v438_v46 }
 0x27b   : > { %v579_v50 = vclamps-f32 %v463_v49, 1.0 }
 0x27d   : > { %v466_v52 = vadd.f32 1.0, %v579_v50 }
 0x27f   : > { %v467_v53 = vmul.f32 %v466_v52, %v424_v51 }
 0x281   : > { %v468_v54 = vpack.c.bf16 %v467_v53, %v467_v53 }
 0x283   : > { %584 = vmatmul.msk.bf16.vlgmr.msra.gmra.mxu2 %vm481_vm13, %v468_v54 }
 0x306   : > { %v494_v56 = vpop.f32.mrf.mxu2 }
 0x307   : > { %v495_v57 = vadd.f32 %v603_v55, %v494_v56 }
 0x309   : > { %499 = vst.msk [vmem:[%s273_s28] sm:$0xff] %vm498_vm14, %v495_v57 }
 0x30e   : > { %v496_v58 = vpop.f32.mrf.mxu2 }
 0x30f PF: > { %s17_s24 = sadd.s32 1, %s618_s24  }
 0x310   : > { %p14_p4 = scmp.ge.s32.totalorder %s17_s24, 4  }
 0x312   :  { %16 = sbr.rel (!%p14_p4) target bundleno = 1 (0x1), region = 78 }

</bundles_post_ra>
